<compile_context>
chip_gen: v5e
topology: v5e:2x2
jax: 0.10.0
libtpu: 0.0.40
codegen_flags: <defaults>
</compile_context>

<pallas_src>
import functools

import jax
import jax.numpy as jnp
from jax import lax
from jax.experimental import pallas as pl
from jax.experimental.pallas import tpu as pltpu

EPS = 1e-5
VMEM_BUDGET_BYTES = 44 << 20   # per-step working-set budget (safe on v7x 64 MiB)


# ----------------------------------------------------------------------------
# Band sizing: bh image-row-pairs per grid step (band = 2*bh*W tokens).
# ----------------------------------------------------------------------------
def _pick_band(h2, w, c, od, x_bytes, out_bytes, weight_bytes, mm_bytes,
               token_target, vmem_budget):
    def vmem_estimate(bh):
        toks = 2 * bh * w
        tile_in = toks * c * x_bytes            # x tile
        tile_out = toks * od * out_bytes        # output tile (bh*W rows, 2*od lanes)
        # in-kernel temporaries: ~3 f32 copies of the tile (x, centered,
        # normalized), the matmul-dtype y, and the f32 accumulator.
        temps = toks * c * (3 * 4 + mm_bytes) + toks * od * 4
        return 2 * tile_in + 2 * tile_out + weight_bytes + temps

    best = 1
    for bh in range(1, h2 + 1):
        if (h2 % bh == 0 and 2 * bh * w <= token_target
                and vmem_estimate(bh) <= vmem_budget):
            best = bh
    # TODO(synk): if H//2 has no divisor near the target (e.g. prime H//2),
    # switch to pl.cdiv + masked remainder bands instead of collapsing to bh=1.
    return best, vmem_estimate(best)


# ----------------------------------------------------------------------------
# Pallas kernel: fused LayerNorm(C) + projection on one band of bh row-pairs.
# ----------------------------------------------------------------------------
def _ln_proj_kernel(x_ref, w_ref, bias_ref, o_ref, *, split_weight):
    """
    x_ref   : (bh, 2, W, C)   activations; dim 1 is the row parity (h = 2i + r)
    w_ref   : (C, od)         gamma-folded weight, or block-diagonal (2C, 2*od)
    bias_ref: (1, 2*od) f32   [beta @ W | beta @ W]
    o_ref   : (bh*W, 2*od)    parity-packed output tokens for this band
    """
    bh, _, ww, cc = x_ref.shape

    # LayerNorm statistics in f32 (v5e has no bf16 VPU; keeps tolerance tight).
    xb = x_ref[...].astype(jnp.float32)                      # (bh, 2, W, C)
    mean = jnp.mean(xb, axis=-1, keepdims=True)
    xc = xb - mean
    var = jnp.mean(xc * xc, axis=-1, keepdims=True)          # biased var (PyTorch LN)
    y = (xc * lax.rsqrt(var + EPS)).astype(w_ref.dtype)      # gamma folded into w

    # Per-parity token slabs, already in output token order (i, w).
    # (When W % 8 == 0 these reshapes are pure views.)
    y0 = y[:, 0].reshape(bh * ww, cc)
    y1 = y[:, 1].reshape(bh * ww, cc)

    w = w_ref[...]
    if split_weight:
        # Block-diagonal weight: the MXU writes [proj(parity0) | proj(parity1)]
        # directly into the 2*od lanes — no unaligned lane concat needed.
        acc = (jnp.dot(y0, w[:cc], preferred_element_type=jnp.float32)
               + jnp.dot(y1, w[cc:], preferred_element_type=jnp.float32))
    else:
        # out_dim is a multiple of 128: aligned lane concat is cheap.
        acc = jnp.concatenate(
            [jnp.dot(y0, w, preferred_element_type=jnp.float32),
             jnp.dot(y1, w, preferred_element_type=jnp.float32)], axis=-1)

    o_ref[...] = (acc + bias_ref[...]).astype(o_ref.dtype)


# ----------------------------------------------------------------------------
# Full module forward.
# ----------------------------------------------------------------------------
def patch_projection_forward(x, params, input_resolution, *,
                             token_target=2048, matmul_dtype=None,
                             single_buffer_params=True):
    """x: (B, H*W, C). Returns (B, H*W, out_dim) in x.dtype."""
    H, W = input_resolution
    B, L, C = x.shape
    assert L == H * W, "input feature has wrong size"
    assert H % 2 == 0 and W % 2 == 0, "patch merging needs even H, W"

    w = params["w"]                                   # (C, out_dim)
    out_dim = w.shape[1]
    if matmul_dtype is None:
        # bf16 activations -> bf16 MXU operands (fast path, halves HBM traffic);
        # f32 activations -> full-f32 matmul (PyTorch parity).
        matmul_dtype = jnp.bfloat16 if x.dtype == jnp.bfloat16 else jnp.float32

    # Fold LayerNorm's affine into the projection:
    #   LN(x) @ W = ((x - mu) * inv) @ (gamma[:, None] * W) + (beta @ W)
    # TODO(synk): in a real model precompute w_mm / bias once at weight-load
    # time instead of re-deriving them on every call.
    gamma = params["gamma"].astype(jnp.float32).reshape(C, 1)
    beta = params["beta"].astype(jnp.float32).reshape(1, C)
    w_f32 = w.astype(jnp.float32)
    w_scaled = gamma * w_f32                                          # (C, out_dim)
    bias_row = jnp.dot(beta, w_f32, precision=lax.Precision.HIGHEST)  # (1, out_dim)

    # Output is written parity-packed: (B, H/2*W, 2*out_dim), which reshapes for
    # free to (B, L, out_dim) in the Swin cat+view token order — no output lane
    # padding and no post-kernel slice for any out_dim.
    use_split_weight = (out_dim % 128) != 0
    if use_split_weight:
        zeros = jnp.zeros_like(w_scaled)
        w_mm = jnp.concatenate(
            [jnp.concatenate([w_scaled, zeros], axis=1),
             jnp.concatenate([zeros, w_scaled], axis=1)], axis=0
        ).astype(matmul_dtype)                        # (2C, 2*out_dim)
    else:
        w_mm = w_scaled.astype(matmul_dtype)          # (C, out_dim)
    bias2 = jnp.concatenate([bias_row, bias_row], axis=1)   # (1, 2*out_dim) f32

    H2 = H // 2
    mm_bytes = jnp.dtype(matmul_dtype).itemsize
    weight_bytes = int(w_mm.shape[0]) * int(w_mm.shape[1]) * mm_bytes
    bh, vmem_est = _pick_band(H2, W, C, out_dim,
                              x.dtype.itemsize, x.dtype.itemsize,
                              weight_bytes, mm_bytes,
                              token_target, VMEM_BUDGET_BYTES)
    n_i = H2 // bh
    grid = (B, n_i)

    # Free view (no HBM movement): the Swin strided-slice + cat + view token
    # permutation  l_out = i*2W + 2w + r  <->  input row 2i + r, column w
    # is expressed entirely by this reshape + the BlockSpec index maps.
    x5 = x.reshape(B, H2, 2, W, C)

    # Constant-index params: single-buffer them (halves their VMEM footprint).
    const_kwargs = {"pipeline_mode": pl.Buffered(1)} if single_buffer_params else {}
    in_specs = [
        pl.BlockSpec((None, bh, 2, W, C), lambda b, i: (b, i, 0, 0, 0)),
        pl.BlockSpec(w_mm.shape, lambda b, i: (0, 0), **const_kwargs),
        pl.BlockSpec((1, 2 * out_dim), lambda b, i: (0, 0), **const_kwargs),
    ]
    out_specs = pl.BlockSpec((None, bh * W, 2 * out_dim), lambda b, i: (b, i, 0))

    m_tot = B * L
    cost = pl.CostEstimate(
        flops=(4 if use_split_weight else 2) * m_tot * C * out_dim + 8 * m_tot * C,
        transcendentals=m_tot,
        bytes_accessed=(m_tot * C + m_tot * out_dim) * x.dtype.itemsize
                       + weight_bytes + 8 * out_dim,
    )
    # Honest VMEM accounting (incl. in-kernel f32 temporaries), capped at 56 MiB
    # so it is safe on v7x's 64 MiB physical VMEM.
    vmem_limit = int(min(max(vmem_est + (8 << 20), 32 << 20), 56 << 20))

    out = pl.pallas_call(
        functools.partial(_ln_proj_kernel, split_weight=use_split_weight),
        out_shape=jax.ShapeDtypeStruct((B, H2 * W, 2 * out_dim), x.dtype),
        grid=grid,
        in_specs=in_specs,
        out_specs=out_specs,
        compiler_params=pltpu.CompilerParams(
            dimension_semantics=("parallel", "parallel"),
            vmem_limit_bytes=vmem_limit,
        ),
        cost_estimate=cost,
    )(x5, w_mm, bias2)

    # (B, H2*W, 2*out_dim) -> (B, L, out_dim): pure view, token order (i, w, r).
    return out.reshape(B, L, out_dim)


# ----------------------------------------------------------------------------
# Pure-JAX reference mirroring the PyTorch module exactly.
# ----------------------------------------------------------------------------
def patch_projection_ref(x, params, input_resolution, *, matmul_dtype=None):
    H, W = input_resolution
    B, L, C = x.shape
    xv = x.astype(jnp.float32).reshape(B, H, W, C)
    x0 = xv[:, 0::2, 0::2, :]
    x1 = xv[:, 1::2, 0::2, :]
    x2 = xv[:, 0::2, 1::2, :]
    x3 = xv[:, 1::2, 1::2, :]
    x_cat = jnp.concatenate([x0, x1, x2, x3], -1).reshape(B, H * W, C)
    mean = jnp.mean(x_cat, axis=-1, keepdims=True)
    var = jnp.mean((x_cat - mean) ** 2, axis=-1, keepdims=True)
    y = (x_cat - mean) / jnp.sqrt(var + EPS) * params["gamma"] + params["beta"]
    w = params["w"].astype(jnp.float32)
    if matmul_dtype is not None:
        y = y.astype(matmul_dtype)
        w = w.astype(matmul_dtype)
    out = jnp.einsum("blc,co->blo", y, w, preferred_element_type=jnp.float32)
    return out.astype(x.dtype)


# ----------------------------------------------------------------------------
# Runner with a safe fallback if this build rejects pl.Buffered(1).
# ----------------------------------------------------------------------------
_SINGLE_BUFFER = [True]


def _forward_checked(x, params, H, W):
    def make(single_buf):
        return jax.jit(functools.partial(patch_projection_forward,
                                         input_resolution=(H, W),
                                         single_buffer_params=single_buf))
    try:
        return jax.block_until_ready(make(_SINGLE_BUFFER[0])(x, params))
    except Exception:
        if not _SINGLE_BUFFER[0]:
            raise
        # Buffered(1) on constant-index params is a VMEM micro-optimization;
        # retry with default double buffering if unsupported.
        _SINGLE_BUFFER[0] = False
        return jax.block_until_ready(make(False)(x, params))


if __name__ == "__main__":
    def _run_case(B, H, W, C, OUT, seed, dtype):
        key = jax.random.PRNGKey(seed)
        kx, kg, kb, kw = jax.random.split(key, 4)
        x = jax.random.normal(kx, (B, H * W, C), dtype=jnp.float32).astype(dtype)
        params = {
            "gamma": 1.0 + 0.1 * jax.random.normal(kg, (C,), dtype=jnp.float32),
            "beta": 0.1 * jax.random.normal(kb, (C,), dtype=jnp.float32),
            # PyTorch Linear stores (out_dim, dim); we keep (dim, out_dim).
            "w": jax.random.normal(kw, (C, OUT), dtype=jnp.float32) / jnp.sqrt(C),
        }
        out = _forward_checked(x, params, H, W)
        assert out.shape == (B, H * W, OUT)
        assert out.dtype == dtype

        out_f32 = out.astype(jnp.float32)
        matched_mm = jnp.bfloat16 if dtype == jnp.bfloat16 else None
        ref_match = patch_projection_ref(x, params, (H, W), matmul_dtype=matched_mm)
        ref_f32 = patch_projection_ref(x, params, (H, W), matmul_dtype=None)
        tol_m = 3e-2 if dtype == jnp.bfloat16 else 2e-2
        tol_f = 6e-2 if dtype == jnp.bfloat16 else 2e-2
        assert jnp.allclose(out_f32, ref_match.astype(jnp.float32),
                            atol=tol_m, rtol=tol_m), "mismatch (matched-dtype ref)"
        assert jnp.allclose(out_f32, ref_f32.astype(jnp.float32),
                            atol=tol_f, rtol=tol_f), "mismatch (f32 ref)"

    # bf16 fast path, lane-aligned projection (128 -> 256).
    _run_case(B=2, H=8, W=8, C=128, OUT=256, seed=0, dtype=jnp.bfloat16)
    # Swin-like dims (96 -> 192): out_dim % 128 != 0 exercises the split-weight
    # parity-packed path (no lane padding, no post-kernel slice).
    _run_case(B=2, H=8, W=8, C=96, OUT=192, seed=1, dtype=jnp.bfloat16)
    # f32 activations: full-f32 matmul parity path.
    _run_case(B=2, H=8, W=8, C=96, OUT=192, seed=2, dtype=jnp.float32)

    print("KERNEL_OK")
</pallas_src>

<mosaic_0001>
module attributes {stable_mosaic.version = 11 : i64} {
  func.func @_ln_proj_kernel(%arg0: i32, %arg1: i32, %arg2: memref<1x4x2x8x128xbf16, #tpu.memory_space<vmem>>, %arg3: memref<128x256xbf16, #tpu.memory_space<vmem>>, %arg4: memref<1x512xf32, #tpu.memory_space<vmem>>, %arg5: memref<1x32x512xbf16, #tpu.memory_space<vmem>>) attributes {dimension_semantics = [#tpu.dimension_semantics<parallel>, #tpu.dimension_semantics<parallel>], iteration_bounds = array<i64: 2, 1>, scalar_prefetch = 0 : i64, scratch_operands = 0 : i64, tpu.core_type = #tpu.core_type<tc>, window_params = [{transform_indices = @transform_0, window_bounds = array<i64: 1, 4, 2, 8, 128>}, {pipeline_mode = #tpu.pipeline_mode<synchronous>, transform_indices = @transform_1, window_bounds = array<i64: 128, 256>}, {pipeline_mode = #tpu.pipeline_mode<synchronous>, transform_indices = @transform_2, window_bounds = array<i64: 1, 512>}, {transform_indices = @transform_3, window_bounds = array<i64: 1, 32, 512>}]} {
    %c0 = arith.constant 0 : index
    %c0_0 = arith.constant 0 : index
    %c0_1 = arith.constant 0 : index
    %c0_2 = arith.constant 0 : index
    %c0_3 = arith.constant 0 : index
    %0 = vector.load %arg2[%c0, %c0_0, %c0_1, %c0_2, %c0_3] : memref<1x4x2x8x128xbf16, #tpu.memory_space<vmem>>, vector<1x4x2x8x128xbf16>
    %1 = vector.shape_cast %0 : vector<1x4x2x8x128xbf16> to vector<4x2x8x128xbf16>
    %2 = arith.extf %1 : vector<4x2x8x128xbf16> to vector<4x2x8x128xf32>
    %cst = arith.constant dense<0.000000e+00> : vector<4x2x8xf32>
    %3 = vector.multi_reduction <add>, %2, %cst [3] : vector<4x2x8x128xf32> to vector<4x2x8xf32>
    %4 = vector.shape_cast %3 : vector<4x2x8xf32> to vector<4x2x8x1xf32>
    %cst_4 = arith.constant 1.280000e+02 : f32
    %5 = vector.broadcast %cst_4 : f32 to vector<4x2x8x1xf32>
    %6 = arith.divf %4, %5 : vector<4x2x8x1xf32>
    %7 = vector.broadcast %6 : vector<4x2x8x1xf32> to vector<4x2x8x128xf32>
    %8 = arith.subf %2, %7 : vector<4x2x8x128xf32>
    %9 = arith.mulf %8, %8 : vector<4x2x8x128xf32>
    %cst_5 = arith.constant dense<0.000000e+00> : vector<4x2x8xf32>
    %10 = vector.multi_reduction <add>, %9, %cst_5 [3] : vector<4x2x8x128xf32> to vector<4x2x8xf32>
    %11 = vector.shape_cast %10 : vector<4x2x8xf32> to vector<4x2x8x1xf32>
    %cst_6 = arith.constant 1.280000e+02 : f32
    %12 = vector.broadcast %cst_6 : f32 to vector<4x2x8x1xf32>
    %13 = arith.divf %11, %12 : vector<4x2x8x1xf32>
    %cst_7 = arith.constant 9.99999974E-6 : f32
    %14 = vector.broadcast %cst_7 : f32 to vector<4x2x8x1xf32>
    %15 = arith.addf %13, %14 : vector<4x2x8x1xf32>
    %16 = math.rsqrt %15 : vector<4x2x8x1xf32>
    %17 = vector.broadcast %16 : vector<4x2x8x1xf32> to vector<4x2x8x128xf32>
    %18 = arith.mulf %8, %17 : vector<4x2x8x128xf32>
    %19 = arith.truncf %18 : vector<4x2x8x128xf32> to vector<4x2x8x128xbf16>
    %20 = vector.extract_strided_slice %19 {offsets = [0, 0, 0, 0], sizes = [4, 1, 8, 128], strides = [1, 1, 1, 1]} : vector<4x2x8x128xbf16> to vector<4x1x8x128xbf16>
    %21 = vector.shape_cast %20 : vector<4x1x8x128xbf16> to vector<4x8x128xbf16>
    %22 = vector.shape_cast %21 : vector<4x8x128xbf16> to vector<32x128xbf16>
    %23 = vector.extract_strided_slice %19 {offsets = [0, 1, 0, 0], sizes = [4, 1, 8, 128], strides = [1, 1, 1, 1]} : vector<4x2x8x128xbf16> to vector<4x1x8x128xbf16>
    %24 = vector.shape_cast %23 : vector<4x1x8x128xbf16> to vector<4x8x128xbf16>
    %25 = vector.shape_cast %24 : vector<4x8x128xbf16> to vector<32x128xbf16>
    %c0_8 = arith.constant 0 : index
    %c0_9 = arith.constant 0 : index
    %26 = vector.load %arg3[%c0_8, %c0_9] : memref<128x256xbf16, #tpu.memory_space<vmem>>, vector<128x256xbf16>
    %cst_10 = arith.constant dense<0.000000e+00> : vector<32x256xf32>
    %27 = tpu.matmul %22, %26, %cst_10 {dimension_numbers = #tpu.dot_dimension_numbers<[1], [0], [0], [1], [0, 0, 1, 1], [], []>} : vector<32x128xbf16>, vector<128x256xbf16>, vector<32x256xf32> -> vector<32x256xf32>
    %cst_11 = arith.constant dense<0.000000e+00> : vector<32x256xf32>
    %28 = tpu.matmul %25, %26, %cst_11 {dimension_numbers = #tpu.dot_dimension_numbers<[1], [0], [0], [1], [0, 0, 1, 1], [], []>} : vector<32x128xbf16>, vector<128x256xbf16>, vector<32x256xf32> -> vector<32x256xf32>
    %29 = tpu.concatenate %27, %28 in 1 : vector<32x256xf32>, vector<32x256xf32> -> vector<32x512xf32>
    %c0_12 = arith.constant 0 : index
    %c0_13 = arith.constant 0 : index
    %30 = vector.load %arg4[%c0_12, %c0_13] : memref<1x512xf32, #tpu.memory_space<vmem>>, vector<1x512xf32>
    %31 = vector.broadcast %30 : vector<1x512xf32> to vector<32x512xf32>
    %32 = arith.addf %29, %31 : vector<32x512xf32>
    %33 = arith.truncf %32 : vector<32x512xf32> to vector<32x512xbf16>
    %c0_14 = arith.constant 0 : index
    %c0_15 = arith.constant 0 : index
    %c0_16 = arith.constant 0 : index
    %34 = vector.load %arg5[%c0_14, %c0_15, %c0_16] : memref<1x32x512xbf16, #tpu.memory_space<vmem>>, vector<1x32x512xbf16>
    %35 = vector.shape_cast %34 : vector<1x32x512xbf16> to vector<32x512xbf16>
    %36 = vector.shape_cast %33 : vector<32x512xbf16> to vector<1x32x512xbf16>
    tpu.vector_store %arg5[%c0_14, %c0_15, %c0_16], %36 {strides = array<i32>} : memref<1x32x512xbf16, #tpu.memory_space<vmem>>, vector<1x32x512xbf16>,
    return
  }
  func.func @transform_0(%arg0: i32, %arg1: i32) -> (i32, i32, i32, i32, i32) {
    %c0_i32 = arith.constant 0 : i32
    %c0_i32_0 = arith.constant 0 : i32
    %c0_i32_1 = arith.constant 0 : i32
    %c0_i32_2 = arith.constant 0 : i32
    return %arg0, %arg1, %c0_i32, %c0_i32_0, %c0_i32_1 : i32, i32, i32, i32, i32
  }
  func.func @transform_1(%arg0: i32, %arg1: i32) -> (i32, i32) {
    %c0_i32 = arith.constant 0 : i32
    %c0_i32_0 = arith.constant 0 : i32
    %c0_i32_1 = arith.constant 0 : i32
    return %c0_i32, %c0_i32_0 : i32, i32
  }
  func.func @transform_2(%arg0: i32, %arg1: i32) -> (i32, i32) {
    %c0_i32 = arith.constant 0 : i32
    %c0_i32_0 = arith.constant 0 : i32
    %c0_i32_1 = arith.constant 0 : i32
    return %c0_i32, %c0_i32_0 : i32, i32
  }
  func.func @transform_3(%arg0: i32, %arg1: i32) -> (i32, i32, i32) {
    %c0_i32 = arith.constant 0 : i32
    %c0_i32_0 = arith.constant 0 : i32
    return %arg0, %arg1, %c0_i32 : i32, i32, i32
  }
}

module attributes {stable_mosaic.version = 11 : i64} {
  func.func @_ln_proj_kernel(%arg0: i32, %arg1: i32, %arg2: memref<1x4x2x8x128xbf16, #tpu.memory_space<vmem>>, %arg3: memref<128x256xbf16, #tpu.memory_space<vmem>>, %arg4: memref<1x512xf32, #tpu.memory_space<vmem>>, %arg5: memref<1x32x512xbf16, #tpu.memory_space<vmem>>) attributes {dimension_semantics = [#tpu.dimension_semantics<parallel>, #tpu.dimension_semantics<parallel>], iteration_bounds = array<i64: 2, 1>, scalar_prefetch = 0 : i64, scratch_operands = 0 : i64, tpu.core_type = #tpu.core_type<tc>, window_params = [{transform_indices = @transform_0, window_bounds = array<i64: 1, 4, 2, 8, 128>}, {pipeline_mode = #tpu.pipeline_mode<synchronous>, transform_indices = @transform_1, window_bounds = array<i64: 128, 256>}, {pipeline_mode = #tpu.pipeline_mode<synchronous>, transform_indices = @transform_2, window_bounds = array<i64: 1, 512>}, {transform_indices = @transform_3, window_bounds = array<i64: 1, 32, 512>}]} {
    %c0 = arith.constant 0 : index
    %c0_0 = arith.constant 0 : index
    %c0_1 = arith.constant 0 : index
    %c0_2 = arith.constant 0 : index
    %c0_3 = arith.constant 0 : index
    %0 = vector.load %arg2[%c0, %c0_0, %c0_1, %c0_2, %c0_3] : memref<1x4x2x8x128xbf16, #tpu.memory_space<vmem>>, vector<1x4x2x8x128xbf16>
    %1 = vector.shape_cast %0 : vector<1x4x2x8x128xbf16> to vector<4x2x8x128xbf16>
    %2 = arith.extf %1 : vector<4x2x8x128xbf16> to vector<4x2x8x128xf32>
    %cst = arith.constant dense<0.000000e+00> : vector<4x2x8xf32>
    %3 = vector.multi_reduction <add>, %2, %cst [3] : vector<4x2x8x128xf32> to vector<4x2x8xf32>
    %4 = vector.shape_cast %3 : vector<4x2x8xf32> to vector<4x2x8x1xf32>
    %cst_4 = arith.constant 1.280000e+02 : f32
    %5 = vector.broadcast %cst_4 : f32 to vector<4x2x8x1xf32>
    %6 = arith.divf %4, %5 : vector<4x2x8x1xf32>
    %7 = vector.broadcast %6 : vector<4x2x8x1xf32> to vector<4x2x8x128xf32>
    %8 = arith.subf %2, %7 : vector<4x2x8x128xf32>
    %9 = arith.mulf %8, %8 : vector<4x2x8x128xf32>
    %cst_5 = arith.constant dense<0.000000e+00> : vector<4x2x8xf32>
    %10 = vector.multi_reduction <add>, %9, %cst_5 [3] : vector<4x2x8x128xf32> to vector<4x2x8xf32>
    %11 = vector.shape_cast %10 : vector<4x2x8xf32> to vector<4x2x8x1xf32>
    %cst_6 = arith.constant 1.280000e+02 : f32
    %12 = vector.broadcast %cst_6 : f32 to vector<4x2x8x1xf32>
    %13 = arith.divf %11, %12 : vector<4x2x8x1xf32>
    %cst_7 = arith.constant 9.99999974E-6 : f32
    %14 = vector.broadcast %cst_7 : f32 to vector<4x2x8x1xf32>
    %15 = arith.addf %13, %14 : vector<4x2x8x1xf32>
    %16 = math.rsqrt %15 : vector<4x2x8x1xf32>
    %17 = vector.broadcast %16 : vector<4x2x8x1xf32> to vector<4x2x8x128xf32>
    %18 = arith.mulf %8, %17 : vector<4x2x8x128xf32>
    %19 = arith.truncf %18 : vector<4x2x8x128xf32> to vector<4x2x8x128xbf16>
    %20 = vector.extract_strided_slice %19 {offsets = [0, 0, 0, 0], sizes = [4, 1, 8, 128], strides = [1, 1, 1, 1]} : vector<4x2x8x128xbf16> to vector<4x1x8x128xbf16>
    %21 = vector.shape_cast %20 : vector<4x1x8x128xbf16> to vector<4x8x128xbf16>
    %22 = vector.shape_cast %21 : vector<4x8x128xbf16> to vector<32x128xbf16>
    %23 = vector.extract_strided_slice %19 {offsets = [0, 1, 0, 0], sizes = [4, 1, 8, 128], strides = [1, 1, 1, 1]} : vector<4x2x8x128xbf16> to vector<4x1x8x128xbf16>
    %24 = vector.shape_cast %23 : vector<4x1x8x128xbf16> to vector<4x8x128xbf16>
    %25 = vector.shape_cast %24 : vector<4x8x128xbf16> to vector<32x128xbf16>
    %c0_8 = arith.constant 0 : index
    %c0_9 = arith.constant 0 : index
    %26 = vector.load %arg3[%c0_8, %c0_9] : memref<128x256xbf16, #tpu.memory_space<vmem>>, vector<128x256xbf16>
    %cst_10 = arith.constant dense<0.000000e+00> : vector<32x256xf32>
    %27 = tpu.matmul %22, %26, %cst_10 {dimension_numbers = #tpu.dot_dimension_numbers<[1], [0], [0], [1], [0, 0, 1, 1], [], []>} : vector<32x128xbf16>, vector<128x256xbf16>, vector<32x256xf32> -> vector<32x256xf32>
    %cst_11 = arith.constant dense<0.000000e+00> : vector<32x256xf32>
    %28 = tpu.matmul %25, %26, %cst_11 {dimension_numbers = #tpu.dot_dimension_numbers<[1], [0], [0], [1], [0, 0, 1, 1], [], []>} : vector<32x128xbf16>, vector<128x256xbf16>, vector<32x256xf32> -> vector<32x256xf32>
    %29 = tpu.concatenate %27, %28 in 1 : vector<32x256xf32>, vector<32x256xf32> -> vector<32x512xf32>
    %c0_12 = arith.constant 0 : index
    %c0_13 = arith.constant 0 : index
    %30 = vector.load %arg4[%c0_12, %c0_13] : memref<1x512xf32, #tpu.memory_space<vmem>>, vector<1x512xf32>
    %31 = vector.broadcast %30 : vector<1x512xf32> to vector<32x512xf32>
    %32 = arith.addf %29, %31 : vector<32x512xf32>
    %33 = arith.truncf %32 : vector<32x512xf32> to vector<32x512xbf16>
    %c0_14 = arith.constant 0 : index
    %c0_15 = arith.constant 0 : index
    %c0_16 = arith.constant 0 : index
    %34 = vector.load %arg5[%c0_14, %c0_15, %c0_16] : memref<1x32x512xbf16, #tpu.memory_space<vmem>>, vector<1x32x512xbf16>
    %35 = vector.shape_cast %34 : vector<1x32x512xbf16> to vector<32x512xbf16>
    %36 = vector.shape_cast %33 : vector<32x512xbf16> to vector<1x32x512xbf16>
    tpu.vector_store %arg5[%c0_14, %c0_15, %c0_16], %36 {strides = array<i32>} : memref<1x32x512xbf16, #tpu.memory_space<vmem>>, vector<1x32x512xbf16>,
    return
  }
  func.func @transform_0(%arg0: i32, %arg1: i32) -> (i32, i32, i32, i32, i32) {
    %c0_i32 = arith.constant 0 : i32
    %c0_i32_0 = arith.constant 0 : i32
    %c0_i32_1 = arith.constant 0 : i32
    %c0_i32_2 = arith.constant 0 : i32
    return %arg0, %arg1, %c0_i32, %c0_i32_0, %c0_i32_1 : i32, i32, i32, i32, i32
  }
  func.func @transform_1(%arg0: i32, %arg1: i32) -> (i32, i32) {
    %c0_i32 = arith.constant 0 : i32
    %c0_i32_0 = arith.constant 0 : i32
    %c0_i32_1 = arith.constant 0 : i32
    return %c0_i32, %c0_i32_0 : i32, i32
  }
  func.func @transform_2(%arg0: i32, %arg1: i32) -> (i32, i32) {
    %c0_i32 = arith.constant 0 : i32
    %c0_i32_0 = arith.constant 0 : i32
    %c0_i32_1 = arith.constant 0 : i32
    return %c0_i32, %c0_i32_0 : i32, i32
  }
  func.func @transform_3(%arg0: i32, %arg1: i32) -> (i32, i32, i32) {
    %c0_i32 = arith.constant 0 : i32
    %c0_i32_0 = arith.constant 0 : i32
    return %arg0, %arg1, %c0_i32 : i32, i32, i32
  }
}

</mosaic_0001>

<bundles_post_ra>
// kernel: patch_projection_forward.1
= control target key start
LH: loop header
LB: loop body
LE: loop exit
PB: predicated region body
PF: predicated region fallthrough
CT: control target
= control target key end

     0   :  { %s940_s12 = smov 0   ;;  %s942_s13 = smov 0   ;;  %s1208_s0 = inlined_call_operand.vmem [shape: bf16[2,4,2,8,128], index: 0, kind: input, shape index: {}]   ;;  %s1209_s1 = inlined_call_operand.vmem [shape: bf16[128,256], index: 1, kind: input, shape index: {}]   ;;  %s1210_s2 = inlined_call_operand.vmem [shape: f32[1,512], index: 2, kind: input, shape index: {}]   ;;  %s1211_s3 = inlined_call_operand.vmem [shape: bf16[2,32,512], index: 3, kind: output, shape index: {}]  }
   0x1   :  { %s944_s14 = smov 0  }
   0x2 LB: > { %s25_s15 = sadd.s32 1, %s913_s13  ;;  %p744_p0 = scmp.ge.s32.totalorder %s917_s14, 1  ;;  %s917_s14 = sphi %s944_s14, %s13_s14   ;;  %s913_s13 = sphi %s942_s13, %s1221_s13   ;;  %s909_s12 = sphi %s940_s12, %s1220_s12  }
   0x3   : > { %p27_p1 = scmp.ge.s32.totalorder %s25_s15, 2  ;;  %p159_p2 = scmp.lt.s32.totalorder %s917_s14, 3 }
   0x5   : > { %s1223_s15 = smov (%p27_p1, %s25_s15), 0  ;;  %p160_p3 = pnand %p744_p0, %p159_p2 }
   0x6   : > { %p194_p4 = scmp.lt.s32.totalorder (!%p160_p3), %s909_s12, 1 }
   0x7   : > { %163 = sbr.rel (%p160_p3) target bundleno = 455 (0x1c7), region = 32 }
   0xc   : > { %s1225_s12 = smov (!%p194_p4, %s909_s12), 1  ;;  %v919_v12 = vmov 128.0   ;;  %v807_v51 = vld [vmem:[%s1209_s1 + $0x70] sm:$0xf]  ;;  %v832_v52 = vld [vmem:[%s1209_s1 + $0x74] sm:$0xf0] }
   0xd   : > { %s815_s16 = sshll.u32 %s1225_s12, 5  ;;  %877 = vrcp.f32 %v919_v12  ;;  %v831_v53 = vld [vmem:[%s1209_s1 + $0x74] sm:$0xf]  ;;  %v808_v54 = vor.u32 %v832_v52, %v807_v51  ;;  %v809_v55 = vld [vmem:[%s1209_s1 + $0x78] sm:$0xf0]  ;;  %s816_s17 = sshll.u32 %s1225_s12, 6 }
   0xe   : > { %s202_s19 = scalar_lea.vmem %s1208_s0, %s815_s16  ;;  %v812_v56 = vor.u32 %v831_v53, %v809_v55  ;;  %v799_v57 = vld [vmem:[%s1209_s1 + $0x60] sm:$0xf]  ;;  %v830_v58 = vld [vmem:[%s1209_s1 + $0x64] sm:$0xf0]  ;;  %v829_v59 = vld [vmem:[%s1209_s1 + $0x64] sm:$0xf]  ;;  %s1189_s20 = scalar_lea.vmem %s1211_s3, %s816_s17 }
   0xf   : > { %v850_v0 = vld [vmem:[%s202_s19 + $0x10] sm:$0xff]   ;;  %v834_v1 = vld [vmem:[%s202_s19] sm:$0xff]   ;;  %v851_v5 = vld [vmem:[%s202_s19 + $0x18] sm:$0xff]   ;;  %514 = vmatpush.bf16.msra.mxu0 %v808_v54  ;;  %564 = vmatpush.bf16.msra.mxu2 %v808_v54  ;;  %v800_v60 = vor.u32 %v830_v58, %v799_v57 }
  0x10   : > { %v844_v2 = vunpack.c.h.bf16 %v850_v0  ;;  %v836_v3 = vunpack.c.h.bf16 %v834_v1  ;;  %v835_v4 = vunpack.c.l.bf16 %v834_v1  ;;  %v849_v6 = vld [vmem:[%s202_s19 + $0x8] sm:$0xff]   ;;  %v848_v7 = vunpack.c.h.bf16 %v851_v5  ;;  %533 = vmatpush.bf16.msra.mxu1 %v812_v56  ;;  %583 = vmatpush.bf16.msra.mxu3 %v812_v56  ;;  %v791_v63 = vld [vmem:[%s1209_s1 + $0x50] sm:$0xf]  ;;  %v827_v1 = vld [vmem:[%s1209_s1 + $0x54] sm:$0xf] }
  0x11   : > { %v840_v8 = vunpack.c.h.bf16 %v849_v6  ;;  %v839_v9 = vunpack.c.l.bf16 %v849_v6  ;;  %v843_v10 = vunpack.c.l.bf16 %v850_v0  ;;  %v847_v11 = vunpack.c.l.bf16 %v851_v5  ;;  %v801_v61 = vld [vmem:[%s1209_s1 + $0x68] sm:$0xf0]  ;;  %v828_v0 = vld [vmem:[%s1209_s1 + $0x54] sm:$0xf0]  ;;  %v783_v5 = vld [vmem:[%s1209_s1 + $0x40] sm:$0xf] }
  0x12   : > { %241 = vadd.xlane.f32.xlu2 %v844_v2  ;;  %233 = vadd.xlane.f32.xlu0 %v836_v3  ;;  %v804_v62 = vor.u32 %v829_v59, %v801_v61  ;;  %v826_v6 = vld [vmem:[%s1209_s1 + $0x44] sm:$0xf0]  ;;  %v824_v12 = vld [vmem:[%s1209_s1 + $0x34] sm:$0xf0] }
  0x13   : > { %231 = vadd.xlane.f32.xlu1 %v835_v4  ;;  %v878_v13 = vpop.eup %877  ;;  %515 = vmatpush.bf16.msra.mxu0 %v800_v60 }
  0x14   : > { %v248_v14 = vmul.f32 128.0, %v878_v13  ;;  %vm252_vm0 = vweird.f32 %v878_v13  ;;  %565 = vmatpush.bf16.msra.mxu2 %v800_v60  ;;  %534 = vmatpush.bf16.msra.mxu1 %v804_v62 }
  0x15   : > { %584 = vmatpush.bf16.msra.mxu3 %v804_v62 }
  0x16   : > { %v249_v15 = vsub.f32 1.0, %v248_v14 }
  0x18   : > { %v250_v16 = vmul.f32 %v878_v13, %v249_v15  ;;  %v777_v15 = vld [vmem:[%s1209_s1 + $0x38] sm:$0xf0] }
  0x1a   : > { %245 = vadd.xlane.f32.xlu2 %v848_v7  ;;  %237 = vadd.xlane.f32.xlu0 %v840_v8  ;;  %v251_v17 = vadd.f32 %v878_v13, %v250_v16 }
  0x1b   : > { %235 = vadd.xlane.f32.xlu1 %v839_v9 }
  0x1c   : > { %v964_v18 = vsel %vm252_vm0, %v878_v13, %v251_v17  ;;  %v823_v13 = vld [vmem:[%s1209_s1 + $0x34] sm:$0xf]  ;;  %v767_v17 = vld [vmem:[%s1209_s1 + $0x20] sm:$0xf] }
  0x1d   : > { %v780_v16 = vor.u32 %v823_v13, %v777_v15 }
  0x22   : > { %239 = vadd.xlane.f32.xlu0 %v843_v10 }
  0x23   : > { %243 = vadd.xlane.f32.xlu1 %v847_v11 }
  0x85   : > { %v242_v19 = vpop.xlane.xlu2 %241  ;;  %v234_v20 = vpop.xlane.xlu0 %233 }
  0x86   : > { %v255_v21 = vmul.f32 %v964_v18, %v234_v20  ;;  %v232_v22 = vpop.xlane.xlu1 %231  ;;  %v259_v34 = vmul.f32 %v964_v18, %v242_v19  ;;  %v822_v19 = vld [vmem:[%s1209_s1 + $0x24] sm:$0xf0]  ;;  %v821_v20 = vld [vmem:[%s1209_s1 + $0x24] sm:$0xf] }
  0x87   : > { %v254_v23 = vmul.f32 %v964_v18, %v232_v22  ;;  %v769_v22 = vld [vmem:[%s1209_s1 + $0x28] sm:$0xf0] }
  0x88   : > { %v968_v24 = vsub.f32 %v836_v3, %v255_v21  ;;  %v992_v41 = vsub.f32 %v844_v2, %v259_v34  ;;  %v792_v2 = vor.u32 %v828_v0, %v791_v63  ;;  %v793_v3 = vld [vmem:[%s1209_s1 + $0x58] sm:$0xf0]  ;;  %v768_v21 = vor.u32 %v822_v19, %v767_v17 }
  0x89   : > { %v970_v25 = vsub.f32 %v835_v4, %v254_v23  ;;  %v796_v4 = vor.u32 %v827_v1, %v793_v3  ;;  %v772_v23 = vor.u32 %v821_v20, %v769_v22 }
  0x8a   : > { %v271_v26 = vmul.f32 %v968_v24, %v968_v24  ;;  %v275_v46 = vmul.f32 %v992_v41, %v992_v41  ;;  %516 = vmatpush.bf16.msra.mxu0 %v792_v2  ;;  %566 = vmatpush.bf16.msra.mxu2 %v792_v2 }
  0x8b   : > { %v270_v27 = vmul.f32 %v970_v25, %v970_v25  ;;  %535 = vmatpush.bf16.msra.mxu1 %v796_v4  ;;  %585 = vmatpush.bf16.msra.mxu3 %v796_v4 }
  0x8c   : > { %280 = vadd.xlane.f32.xlu2 %v271_v26  ;;  %v759_v26 = vld [vmem:[%s1209_s1 + $0x10] sm:$0xf] }
  0x8d   : > { %278 = vadd.xlane.f32.xlu1 %v270_v27  ;;  %v246_v28 = vpop.xlane.xlu2 %245  ;;  %v238_v29 = vpop.xlane.xlu0 %237  ;;  %v820_v27 = vld [vmem:[%s1209_s1 + $0x14] sm:$0xf0] }
  0x8e   : > { %v261_v30 = vmul.f32 %v964_v18, %v246_v28  ;;  %v257_v31 = vmul.f32 %v964_v18, %v238_v29  ;;  %v236_v32 = vpop.xlane.xlu1 %235  ;;  %v819_v28 = vld [vmem:[%s1209_s1 + $0x14] sm:$0xf] }
  0x8f   : > { %v256_v33 = vmul.f32 %v964_v18, %v236_v32 }
  0x90   : > { %v980_v35 = vsub.f32 %v848_v7, %v261_v30  ;;  %v982_v36 = vsub.f32 %v840_v8, %v257_v31  ;;  %v825_v7 = vld [vmem:[%s1209_s1 + $0x44] sm:$0xf]  ;;  %v784_v8 = vor.u32 %v826_v6, %v783_v5  ;;  %v760_v30 = vor.u32 %v820_v27, %v759_v26  ;;  %v761_v31 = vld [vmem:[%s1209_s1 + $0x18] sm:$0xf0] }
  0x91   : > { %v984_v37 = vsub.f32 %v839_v9, %v256_v33  ;;  %v785_v9 = vld [vmem:[%s1209_s1 + $0x48] sm:$0xf0]  ;;  %v764_v34 = vor.u32 %v819_v28, %v761_v31 }
  0x92   : > { %v273_v38 = vmul.f32 %v982_v36, %v982_v36  ;;  %v277_v39 = vmul.f32 %v980_v35, %v980_v35  ;;  %517 = vmatpush.bf16.msra.mxu0 %v784_v8  ;;  %567 = vmatpush.bf16.msra.mxu2 %v784_v8 }
  0x93   : > { %v272_v40 = vmul.f32 %v984_v37, %v984_v37 }
  0x94   : > { %284 = vadd.xlane.f32.xlu0 %v273_v38 }
  0x95   : > { %292 = vadd.xlane.f32.xlu1 %v277_v39  ;;  %282 = vadd.xlane.f32.xlu2 %v272_v40  ;;  %v240_v42 = vpop.xlane.xlu0 %239  ;;  %v751_v40 = vld [vmem:[%s1209_s1] sm:$0xf] }
  0x96   : > { %v258_v43 = vmul.f32 %v964_v18, %v240_v42  ;;  %v244_v44 = vpop.xlane.xlu1 %243  ;;  %v818_v42 = vld [vmem:[%s1209_s1 + $0x4] sm:$0xf0] }
  0x97   : > { %v260_v47 = vmul.f32 %v964_v18, %v244_v44  ;;  %v752_v44 = vor.u32 %v818_v42, %v751_v40 }
  0x98   : > { %v995_v45 = vsub.f32 %v843_v10, %v258_v43  ;;  %v788_v10 = vor.u32 %v825_v7, %v785_v9 }
  0x99   : > { %v1002_v49 = vsub.f32 %v847_v11, %v260_v47  ;;  %v775_v11 = vld [vmem:[%s1209_s1 + $0x30] sm:$0xf]  ;;  %v753_v47 = vld [vmem:[%s1209_s1 + $0x8] sm:$0xf0] }
  0x9a   : > { %v274_v48 = vmul.f32 %v995_v45, %v995_v45  ;;  %536 = vmatpush.bf16.msra.mxu1 %v788_v10  ;;  %586 = vmatpush.bf16.msra.mxu3 %v788_v10  ;;  %v776_v14 = vor.u32 %v824_v12, %v775_v11 }
  0x9b   : > { %v276_v50 = vmul.f32 %v1002_v49, %v1002_v49 }
  0x9c   : > { %288 = vadd.xlane.f32.xlu0 %v275_v46  ;;  %518 = vmatpush.bf16.msra.mxu0 %v776_v14  ;;  %v817_v46 = vld [vmem:[%s1209_s1 + $0x4] sm:$0xf] }
  0x9d   : > { %286 = vadd.xlane.f32.xlu2 %v274_v48  ;;  %568 = vmatpush.bf16.msra.mxu2 %v776_v14  ;;  %v756_v48 = vor.u32 %v817_v46, %v753_v47 }
  0x9e   : > { %537 = vmatpush.bf16.msra.mxu1 %v780_v16  ;;  %587 = vmatpush.bf16.msra.mxu3 %v780_v16 }
  0xa0   : > { %519 = vmatpush.bf16.msra.mxu0 %v768_v21 }
  0xa1   : > { %569 = vmatpush.bf16.msra.mxu2 %v768_v21 }
  0xa2   : > { %538 = vmatpush.bf16.msra.mxu1 %v772_v23  ;;  %588 = vmatpush.bf16.msra.mxu3 %v772_v23 }
  0xa4   : > { %290 = vadd.xlane.f32.xlu0 %v276_v50  ;;  %520 = vmatpush.bf16.msra.mxu0 %v760_v30 }
  0xa5   : > { %570 = vmatpush.bf16.msra.mxu2 %v760_v30 }
  0xa6   : > { %539 = vmatpush.bf16.msra.mxu1 %v764_v34  ;;  %589 = vmatpush.bf16.msra.mxu3 %v764_v34 }
  0xa8   : > { %521 = vmatpush.bf16.msra.mxu0 %v752_v44 }
  0xa9   : > { %571 = vmatpush.bf16.msra.mxu2 %v752_v44 }
  0xaa   : > { %540 = vmatpush.bf16.msra.mxu1 %v756_v48  ;;  %590 = vmatpush.bf16.msra.mxu3 %v756_v48 }
  0xff   : > { %v281_v29 = vpop.xlane.xlu2 %280 }
 0x100   : > { %v295_v32 = vmul.f32 %v281_v29, %v964_v18  ;;  %v279_v33 = vpop.xlane.xlu1 %278 }
 0x101   : > { %v294_v38 = vmul.f32 %v279_v33, %v964_v18 }
 0x102   : > { %v303_v39 = vadd.f32 1e-05, %v295_v32 }
 0x103   : > { %v302_v43 = vadd.f32 1e-05, %v294_v38 }
 0x104   : > { %879 = vrsqrt.f32 %v303_v39  ;;  %vm326_vm4 = vweird.f32 %v303_v39 }
 0x105   : > { %881 = vrsqrt.f32 %v302_v43  ;;  %vm316_vm2 = vweird.f32 %v302_v43 }
 0x107   : > { %v285_v50 = vpop.xlane.xlu0 %284 }
 0x108   : > { %v297_v51 = vmul.f32 %v285_v50, %v964_v18  ;;  %v283_v52 = vpop.xlane.xlu2 %282  ;;  %v293_v53 = vpop.xlane.xlu1 %292 }
 0x109   : > { %v296_v54 = vmul.f32 %v283_v52, %v964_v18  ;;  %v301_v55 = vmul.f32 %v293_v53, %v964_v18 }
 0x10a   : > { %v880_v56 = vpop.eup %879  ;;  %v305_v57 = vadd.f32 1e-05, %v297_v51 }
 0x10b   : > { %v882_v58 = vpop.eup %881  ;;  %v321_v59 = vmul.f32 %v880_v56, %v303_v39  ;;  %v304_v60 = vadd.f32 1e-05, %v296_v54  ;;  %v1107_v61 = vadd.f32 1e-05, %v301_v55  ;;  %vm327_vm1 = vweird.f32 %v880_v56 }
 0x10c   : > { %v311_v62 = vmul.f32 %v882_v58, %v302_v43  ;;  %883 = vrsqrt.f32 %v305_v57  ;;  %vm317_vm3 = vweird.f32 %v882_v58  ;;  %vm1120_vm5 = vmor %vm326_vm4, %vm327_vm1  ;;  %vm346_vm10 = vweird.f32 %v305_v57 }
 0x10d   : > { %v322_v63 = vmul.f32 %v880_v56, %v321_v59  ;;  %885 = vrsqrt.f32 %v304_v60  ;;  %vm1126_vm6 = vmor %vm316_vm2, %vm317_vm3  ;;  %vm336_vm8 = vweird.f32 %v304_v60  ;;  %vm386_vm13 = vweird.f32 %v1107_v61 }
 0x10e   : > { %v312_v0 = vmul.f32 %v882_v58, %v311_v62  ;;  %887 = vrsqrt.f32 %v1107_v61 }
 0x10f   : > { %v323_v1 = vmul.f32 0.5, %v322_v63  ;;  %v289_v2 = vpop.xlane.xlu0 %288 }
 0x110   : > { %v313_v3 = vmul.f32 0.5, %v312_v0  ;;  %v299_v4 = vmul.f32 %v289_v2, %v964_v18  ;;  %v287_v5 = vpop.xlane.xlu2 %286 }
 0x111   : > { %v324_v6 = vsub.f32 1.5, %v323_v1  ;;  %v298_v7 = vmul.f32 %v287_v5, %v964_v18 }
 0x112   : > { %v884_v8 = vpop.eup %883  ;;  %v314_v9 = vsub.f32 1.5, %v313_v3  ;;  %v1112_v10 = vadd.f32 1e-05, %v299_v4 }
 0x113   : > { %v886_v11 = vpop.eup %885  ;;  %v341_v12 = vmul.f32 %v884_v8, %v305_v57  ;;  %v1114_v13 = vadd.f32 1e-05, %v298_v7  ;;  %v325_v14 = vmul.f32 %v880_v56, %v324_v6  ;;  %vm347_vm7 = vweird.f32 %v884_v8 }
 0x114   : > { %v1116_v15 = vpop.eup %887  ;;  %v331_v16 = vmul.f32 %v886_v11, %v304_v60  ;;  %889 = vrsqrt.f32 %v1112_v10  ;;  %v315_v22 = vmul.f32 %v882_v58, %v314_v9  ;;  %vm337_vm9 = vweird.f32 %v886_v11  ;;  %vm348_vm11 = vmor %vm346_vm10, %vm347_vm7 }
 0x115   : > { %v342_v17 = vmul.f32 %v884_v8, %v341_v12  ;;  %891 = vrsqrt.f32 %v1114_v13  ;;  %v381_v21 = vmul.f32 %v1116_v15, %v1107_v61  ;;  %v329_v28 = vsel %vm1120_vm5, %v880_v56, %v325_v14  ;;  %vm338_vm12 = vmor %vm336_vm8, %vm337_vm9 }
 0x116   : > { %v332_v20 = vmul.f32 %v886_v11, %v331_v16  ;;  %v319_v31 = vsel %vm1126_vm6, %v882_v58, %v315_v22  ;;  %v391_v40 = vmul.f32 %v329_v28, %v968_v24  ;;  %vm387_vm14 = vweird.f32 %v1116_v15 }
 0x117   : > { %v343_v26 = vmul.f32 0.5, %v342_v17  ;;  %v291_v27 = vpop.xlane.xlu0 %290  ;;  %v382_v38 = vmul.f32 %v1116_v15, %v381_v21  ;;  %v390_v43 = vmul.f32 %v319_v31, %v970_v25  ;;  %vm356_vm15 = vweird.f32 %v1114_v13  ;;  %vm1163_vm3 = vmor %vm386_vm13, %vm387_vm14 }
 0x118   : > { %v333_v29 = vmul.f32 0.5, %v332_v20  ;;  %v300_v30 = vmul.f32 %v291_v27, %v964_v18  ;;  %v399_v51 = vpack.c.bf16 %v391_v40, %v391_v40  ;;  %vm366_vm4 = vweird.f32 %v1112_v10 }
 0x119   : > { %v344_v32 = vsub.f32 1.5, %v343_v26  ;;  %v383_v24 = vmul.f32 0.5, %v382_v38  ;;  %v398_v54 = vpack.c.bf16 %v390_v43, %v390_v43 }
 0x11a   : > { %v1135_v33 = vpop.eup %889  ;;  %v334_v34 = vsub.f32 1.5, %v333_v29  ;;  %v1138_v39 = vadd.f32 1e-05, %v300_v30  ;;  %v556_v3 = vunpack.c.l.b16 %v399_v51 }
 0x11b   : > { %v892_v42 = vpop.eup %891  ;;  %v361_v18 = vmul.f32 %v1135_v33, %v1112_v10  ;;  %v345_v48 = vmul.f32 %v884_v8, %v344_v32  ;;  %v384_v60 = vsub.f32 1.5, %v383_v24  ;;  %vm367_vm1 = vweird.f32 %v1135_v33 }
 0x11c   : > { %v351_v44 = vmul.f32 %v892_v42, %v1114_v13  ;;  %893 = vrsqrt.f32 %v1138_v39  ;;  %v335_v47 = vmul.f32 %v886_v11, %v334_v34  ;;  %vm357_vm0 = vweird.f32 %v892_v42  ;;  %vm368_vm5 = vmor %vm366_vm4, %vm367_vm1 }
 0x11d   : > { %v362_v46 = vmul.f32 %v1135_v33, %v361_v18  ;;  %v349_v55 = vsel %vm348_vm11, %v884_v8, %v345_v48  ;;  %v426_v2 = vunpack.c.l.b16 %v398_v54  ;;  %vm1154_vm2 = vmor %vm356_vm15, %vm357_vm0  ;;  %v385_v12 = vmul.f32 %v1116_v15, %v384_v60 }
 0x11e   : > { %v352_v50 = vmul.f32 %v892_v42, %v351_v44  ;;  %v339_v53 = vsel %vm338_vm12, %v886_v11, %v335_v47  ;;  %v393_v57 = vmul.f32 %v349_v55, %v982_v36  ;;  %vm376_vm6 = vweird.f32 %v1138_v39 }
 0x11f   : > { %v363_v52 = vmul.f32 0.5, %v362_v46  ;;  %v392_v56 = vmul.f32 %v339_v53, %v984_v37  ;;  %v389_v17 = vsel %vm1163_vm3, %v1116_v15, %v385_v12 }
 0x120   : > { %v353_v25 = vmul.f32 0.5, %v352_v50  ;;  %v401_v0 = vpack.c.bf16 %v393_v57, %v393_v57  ;;  %v397_v22 = vmul.f32 %v389_v17, %v980_v35  ;;  %v602_v35 = vld [vmem:[%s1210_s2] sm:$0xf] }
 0x121   : > { %v364_v58 = vsub.f32 1.5, %v363_v52  ;;  %v400_v63 = vpack.c.bf16 %v392_v56, %v392_v56  ;;  %v606_v18 = vperm.slane %v602_v35, 2  ;;  %v607_v43 = vperm.slane %v602_v35, 3 }
 0x122   : > { %v894_v59 = vpop.eup %893  ;;  %v354_v62 = vsub.f32 1.5, %v353_v25  ;;  %v557_v4 = vunpack.c.l.b16 %v401_v0  ;;  %v405_v29 = vpack.c.bf16 %v397_v22, %v397_v22 }
 0x123   : > { %v371_v1 = vmul.f32 %v894_v59, %v1138_v39  ;;  %v427_v36 = vunpack.c.l.b16 %v400_v63  ;;  %v365_v6 = vmul.f32 %v1135_v33, %v364_v58  ;;  %vm377_vm7 = vweird.f32 %v894_v59 }
 0x124   : > { %v355_v5 = vmul.f32 %v892_v42, %v354_v62  ;;  %v560_v11 = vpack.c.b16 %v557_v4, %v556_v3  ;;  %vm378_vm8 = vmor %vm376_vm6, %vm377_vm7 }
 0x125   : > { %v372_v7 = vmul.f32 %v894_v59, %v371_v1  ;;  %v430_v9 = vpack.c.b16 %v427_v36, %v426_v2  ;;  %v369_v61 = vsel %vm368_vm5, %v1135_v33, %v365_v6  ;;  %v559_v33 = vunpack.c.l.b16 %v405_v29 }
 0x126   : > { %v359_v14 = vsel %vm1154_vm2, %v892_v42, %v355_v5  ;;  %572 = vmatmul.bf16.vlgmr.msra.gmra.mxu2 %v560_v11  ;;  %591 = vmatmul.bf16.vlgmr.msra.gmra.mxu3 %v560_v11  ;;  %v395_v20 = vmul.f32 %v369_v61, %v992_v41  ;;  %v604_v41 = vperm.slane %v602_v35, 0 }
 0x127   : > { %v373_v13 = vmul.f32 0.5, %v372_v7  ;;  %522 = vmatmul.bf16.vlgmr.msra.gmra.mxu0 %v430_v9  ;;  %541 = vmatmul.bf16.vlgmr.msra.gmra.mxu1 %v430_v9  ;;  %v394_v10 = vmul.f32 %v359_v14, %v995_v45 }
 0x128   : > { %v403_v27 = vpack.c.bf16 %v395_v20, %v395_v20 }
 0x129   : > { %v374_v16 = vsub.f32 1.5, %v373_v13  ;;  %v402_v26 = vpack.c.bf16 %v394_v10, %v394_v10 }
 0x12a   : > { %v558_v31 = vunpack.c.l.b16 %v403_v27 }
 0x12b   : > { %v375_v19 = vmul.f32 %v894_v59, %v374_v16  ;;  %v428_v30 = vunpack.c.l.b16 %v402_v26 }
 0x12c   : > { %v561_v15 = vpack.c.b16 %v559_v33, %v558_v31 }
 0x12d   : > { %v379_v21 = vsel %vm378_vm8, %v894_v59, %v375_v19 }
 0x12e   : > { %v396_v23 = vmul.f32 %v379_v21, %v1002_v49  ;;  %v605_v49 = vperm.slane %v602_v35, 1 }
 0x130   : > { %v404_v28 = vpack.c.bf16 %v396_v23, %v396_v23 }
 0x132   : > { %v429_v45 = vunpack.c.l.b16 %v404_v28 }
 0x134   : > { %v431_v32 = vpack.c.b16 %v429_v45, %v428_v30 }
 0x136   : > { %577 = vmatmul.bf16.gmra.mxu2 %v561_v15  ;;  %596 = vmatmul.bf16.gmra.mxu3 %v561_v15 }
 0x137   : > { %527 = vmatmul.bf16.gmra.mxu0 %v431_v32  ;;  %546 = vmatmul.bf16.gmra.mxu1 %v431_v32 }
 0x1a4   : > { %v523_v34 = vpop.f32.mrf.mxu0  ;;  %v542_v38 = vpop.f32.mrf.mxu1 }
 0x1a5   : > { %v612_v39 = vadd.f32 %v604_v41, %v523_v34  ;;  %v613_v40 = vadd.f32 %v605_v49, %v542_v38 }
 0x1a7   : > { %v628_v42 = vpack.c.bf16 %v613_v40, %v612_v39 }
 0x1a9   : > { %636 = vst [vmem:[%s1189_s20] sm:$0xff] %v628_v42  ;;  %v573_v44 = vpop.f32.mrf.mxu2  ;;  %v592_v46 = vpop.f32.mrf.mxu3 }
 0x1aa   : > { %v614_v47 = vadd.f32 %v606_v18, %v573_v44  ;;  %v615_v48 = vadd.f32 %v607_v43, %v592_v46 }
 0x1ac   : > { %v525_v24 = vpop.f32.mrf.mxu0  ;;  %v544_v50 = vpop.f32.mrf.mxu1  ;;  %v629_v53 = vpack.c.bf16 %v615_v48, %v614_v47 }
 0x1ad   : > { %v616_v51 = vadd.f32 %v604_v41, %v525_v24  ;;  %v617_v52 = vadd.f32 %v605_v49, %v544_v50 }
 0x1ae   : > { %637 = vst [vmem:[%s1189_s20 + $0x8] sm:$0xff] %v629_v53 }
 0x1af   : > { %v630_v54 = vpack.c.bf16 %v617_v52, %v616_v51 }
 0x1b1   : > { %638 = vst [vmem:[%s1189_s20 + $0x10] sm:$0xff] %v630_v54  ;;  %v575_v55 = vpop.f32.mrf.mxu2  ;;  %v594_v25 = vpop.f32.mrf.mxu3 }
 0x1b2   : > { %v618_v56 = vadd.f32 %v606_v18, %v575_v55  ;;  %v619_v57 = vadd.f32 %v607_v43, %v594_v25 }
 0x1b4   : > { %v528_v58 = vpop.f32.mrf.mxu0  ;;  %v547_v59 = vpop.f32.mrf.mxu1  ;;  %v631_v63 = vpack.c.bf16 %v619_v57, %v618_v56 }
 0x1b5   : > { %v620_v60 = vadd.f32 %v604_v41, %v528_v58  ;;  %v621_v62 = vadd.f32 %v605_v49, %v547_v59 }
 0x1b6   : > { %639 = vst [vmem:[%s1189_s20 + $0x18] sm:$0xff] %v631_v63 }
 0x1b7   : > { %v632_v0 = vpack.c.bf16 %v621_v62, %v620_v60 }
 0x1b9   : > { %640 = vst [vmem:[%s1189_s20 + $0x20] sm:$0xff] %v632_v0  ;;  %v578_v1 = vpop.f32.mrf.mxu2  ;;  %v597_v2 = vpop.f32.mrf.mxu3 }
 0x1ba   : > { %v622_v3 = vadd.f32 %v606_v18, %v578_v1  ;;  %v623_v37 = vadd.f32 %v607_v43, %v597_v2 }
 0x1bc   : > { %v530_v36 = vpop.f32.mrf.mxu0  ;;  %v549_v4 = vpop.f32.mrf.mxu1  ;;  %v633_v7 = vpack.c.bf16 %v623_v37, %v622_v3 }
 0x1bd   : > { %v624_v5 = vadd.f32 %v604_v41, %v530_v36  ;;  %v625_v6 = vadd.f32 %v605_v49, %v549_v4 }
 0x1be   : > { %641 = vst [vmem:[%s1189_s20 + $0x28] sm:$0xff] %v633_v7 }
 0x1bf   : > { %v634_v8 = vpack.c.bf16 %v625_v6, %v624_v5 }
 0x1c1   : > { %642 = vst [vmem:[%s1189_s20 + $0x30] sm:$0xff] %v634_v8  ;;  %v580_v9 = vpop.f32.mrf.mxu2  ;;  %v599_v11 = vpop.f32.mrf.mxu3 }
 0x1c2   : > { %v626_v12 = vadd.f32 %v606_v18, %v580_v9  ;;  %v627_v13 = vadd.f32 %v607_v43, %v599_v11 }
 0x1c4   : > { %v635_v14 = vpack.c.bf16 %v627_v13, %v626_v12 }
 0x1c6   : > { %643 = vst [vmem:[%s1189_s20 + $0x38] sm:$0xff] %v635_v14 }
 0x1c7 PF: > { %s13_s14 = sadd.s32 1, %s917_s14   ;;  %s1220_s12 = smov %s913_s13 }
 0x1c8   : > { %p10_p5 = scmp.ge.s32.totalorder %s13_s14, 4   ;;  %s1221_s13 = smov %s1223_s15 }
 0x1ca   :  { %12 = sbr.rel (!%p10_p5) target bundleno = 2 (0x2), region = 62 }

// kernel: patch_projection_forward.1
= control target key start
LH: loop header
LB: loop body
LE: loop exit
PB: predicated region body
PF: predicated region fallthrough
CT: control target
= control target key end

     0   :  { %s940_s12 = smov 0   ;;  %s942_s13 = smov 0   ;;  %s1208_s0 = inlined_call_operand.vmem [shape: bf16[2,4,2,8,128], index: 0, kind: input, shape index: {}]   ;;  %s1209_s1 = inlined_call_operand.vmem [shape: bf16[128,256], index: 1, kind: input, shape index: {}]   ;;  %s1210_s2 = inlined_call_operand.vmem [shape: f32[1,512], index: 2, kind: input, shape index: {}]   ;;  %s1211_s3 = inlined_call_operand.vmem [shape: bf16[2,32,512], index: 3, kind: output, shape index: {}]  }
   0x1   :  { %s944_s14 = smov 0  }
   0x2 LB: > { %s25_s15 = sadd.s32 1, %s913_s13  ;;  %p744_p0 = scmp.ge.s32.totalorder %s917_s14, 1  ;;  %s917_s14 = sphi %s944_s14, %s13_s14   ;;  %s913_s13 = sphi %s942_s13, %s1221_s13   ;;  %s909_s12 = sphi %s940_s12, %s1220_s12  }
   0x3   : > { %p27_p1 = scmp.ge.s32.totalorder %s25_s15, 2  ;;  %p159_p2 = scmp.lt.s32.totalorder %s917_s14, 3 }
   0x5   : > { %s1223_s15 = smov (%p27_p1, %s25_s15), 0  ;;  %p160_p3 = pnand %p744_p0, %p159_p2 }
   0x6   : > { %p194_p4 = scmp.lt.s32.totalorder (!%p160_p3), %s909_s12, 1 }
   0x7   : > { %163 = sbr.rel (%p160_p3) target bundleno = 455 (0x1c7), region = 32 }
   0xc   : > { %s1225_s12 = smov (!%p194_p4, %s909_s12), 1  ;;  %v919_v12 = vmov 128.0   ;;  %v807_v51 = vld [vmem:[%s1209_s1 + $0x70] sm:$0xf]  ;;  %v832_v52 = vld [vmem:[%s1209_s1 + $0x74] sm:$0xf0] }
   0xd   : > { %s815_s16 = sshll.u32 %s1225_s12, 5  ;;  %877 = vrcp.f32 %v919_v12  ;;  %v831_v53 = vld [vmem:[%s1209_s1 + $0x74] sm:$0xf]  ;;  %v808_v54 = vor.u32 %v832_v52, %v807_v51  ;;  %v809_v55 = vld [vmem:[%s1209_s1 + $0x78] sm:$0xf0]  ;;  %s816_s17 = sshll.u32 %s1225_s12, 6 }
   0xe   : > { %s202_s19 = scalar_lea.vmem %s1208_s0, %s815_s16  ;;  %v812_v56 = vor.u32 %v831_v53, %v809_v55  ;;  %v799_v57 = vld [vmem:[%s1209_s1 + $0x60] sm:$0xf]  ;;  %v830_v58 = vld [vmem:[%s1209_s1 + $0x64] sm:$0xf0]  ;;  %v829_v59 = vld [vmem:[%s1209_s1 + $0x64] sm:$0xf]  ;;  %s1189_s20 = scalar_lea.vmem %s1211_s3, %s816_s17 }
   0xf   : > { %v850_v0 = vld [vmem:[%s202_s19 + $0x10] sm:$0xff]   ;;  %v834_v1 = vld [vmem:[%s202_s19] sm:$0xff]   ;;  %v851_v5 = vld [vmem:[%s202_s19 + $0x18] sm:$0xff]   ;;  %514 = vmatpush.bf16.msra.mxu0 %v808_v54  ;;  %564 = vmatpush.bf16.msra.mxu2 %v808_v54  ;;  %v800_v60 = vor.u32 %v830_v58, %v799_v57 }
  0x10   : > { %v844_v2 = vunpack.c.h.bf16 %v850_v0  ;;  %v836_v3 = vunpack.c.h.bf16 %v834_v1  ;;  %v835_v4 = vunpack.c.l.bf16 %v834_v1  ;;  %v849_v6 = vld [vmem:[%s202_s19 + $0x8] sm:$0xff]   ;;  %v848_v7 = vunpack.c.h.bf16 %v851_v5  ;;  %533 = vmatpush.bf16.msra.mxu1 %v812_v56  ;;  %583 = vmatpush.bf16.msra.mxu3 %v812_v56  ;;  %v791_v63 = vld [vmem:[%s1209_s1 + $0x50] sm:$0xf]  ;;  %v827_v1 = vld [vmem:[%s1209_s1 + $0x54] sm:$0xf] }
  0x11   : > { %v840_v8 = vunpack.c.h.bf16 %v849_v6  ;;  %v839_v9 = vunpack.c.l.bf16 %v849_v6  ;;  %v843_v10 = vunpack.c.l.bf16 %v850_v0  ;;  %v847_v11 = vunpack.c.l.bf16 %v851_v5  ;;  %v801_v61 = vld [vmem:[%s1209_s1 + $0x68] sm:$0xf0]  ;;  %v828_v0 = vld [vmem:[%s1209_s1 + $0x54] sm:$0xf0]  ;;  %v783_v5 = vld [vmem:[%s1209_s1 + $0x40] sm:$0xf] }
  0x12   : > { %241 = vadd.xlane.f32.xlu2 %v844_v2  ;;  %233 = vadd.xlane.f32.xlu0 %v836_v3  ;;  %v804_v62 = vor.u32 %v829_v59, %v801_v61  ;;  %v826_v6 = vld [vmem:[%s1209_s1 + $0x44] sm:$0xf0]  ;;  %v824_v12 = vld [vmem:[%s1209_s1 + $0x34] sm:$0xf0] }
  0x13   : > { %231 = vadd.xlane.f32.xlu1 %v835_v4  ;;  %v878_v13 = vpop.eup %877  ;;  %515 = vmatpush.bf16.msra.mxu0 %v800_v60 }
  0x14   : > { %v248_v14 = vmul.f32 128.0, %v878_v13  ;;  %vm252_vm0 = vweird.f32 %v878_v13  ;;  %565 = vmatpush.bf16.msra.mxu2 %v800_v60  ;;  %534 = vmatpush.bf16.msra.mxu1 %v804_v62 }
  0x15   : > { %584 = vmatpush.bf16.msra.mxu3 %v804_v62 }
  0x16   : > { %v249_v15 = vsub.f32 1.0, %v248_v14 }
  0x18   : > { %v250_v16 = vmul.f32 %v878_v13, %v249_v15  ;;  %v777_v15 = vld [vmem:[%s1209_s1 + $0x38] sm:$0xf0] }
  0x1a   : > { %245 = vadd.xlane.f32.xlu2 %v848_v7  ;;  %237 = vadd.xlane.f32.xlu0 %v840_v8  ;;  %v251_v17 = vadd.f32 %v878_v13, %v250_v16 }
  0x1b   : > { %235 = vadd.xlane.f32.xlu1 %v839_v9 }
  0x1c   : > { %v964_v18 = vsel %vm252_vm0, %v878_v13, %v251_v17  ;;  %v823_v13 = vld [vmem:[%s1209_s1 + $0x34] sm:$0xf]  ;;  %v767_v17 = vld [vmem:[%s1209_s1 + $0x20] sm:$0xf] }
  0x1d   : > { %v780_v16 = vor.u32 %v823_v13, %v777_v15 }
  0x22   : > { %239 = vadd.xlane.f32.xlu0 %v843_v10 }
  0x23   : > { %243 = vadd.xlane.f32.xlu1 %v847_v11 }
  0x85   : > { %v242_v19 = vpop.xlane.xlu2 %241  ;;  %v234_v20 = vpop.xlane.xlu0 %233 }
  0x86   : > { %v255_v21 = vmul.f32 %v964_v18, %v234_v20  ;;  %v232_v22 = vpop.xlane.xlu1 %231  ;;  %v259_v34 = vmul.f32 %v964_v18, %v242_v19  ;;  %v822_v19 = vld [vmem:[%s1209_s1 + $0x24] sm:$0xf0]  ;;  %v821_v20 = vld [vmem:[%s1209_s1 + $0x24] sm:$0xf] }
  0x87   : > { %v254_v23 = vmul.f32 %v964_v18, %v232_v22  ;;  %v769_v22 = vld [vmem:[%s1209_s1 + $0x28] sm:$0xf0] }
  0x88   : > { %v968_v24 = vsub.f32 %v836_v3, %v255_v21  ;;  %v992_v41 = vsub.f32 %v844_v2, %v259_v34  ;;  %v792_v2 = vor.u32 %v828_v0, %v791_v63  ;;  %v793_v3 = vld [vmem:[%s1209_s1 + $0x58] sm:$0xf0]  ;;  %v768_v21 = vor.u32 %v822_v19, %v767_v17 }
  0x89   : > { %v970_v25 = vsub.f32 %v835_v4, %v254_v23  ;;  %v796_v4 = vor.u32 %v827_v1, %v793_v3  ;;  %v772_v23 = vor.u32 %v821_v20, %v769_v22 }
  0x8a   : > { %v271_v26 = vmul.f32 %v968_v24, %v968_v24  ;;  %v275_v46 = vmul.f32 %v992_v41, %v992_v41  ;;  %516 = vmatpush.bf16.msra.mxu0 %v792_v2  ;;  %566 = vmatpush.bf16.msra.mxu2 %v792_v2 }
  0x8b   : > { %v270_v27 = vmul.f32 %v970_v25, %v970_v25  ;;  %535 = vmatpush.bf16.msra.mxu1 %v796_v4  ;;  %585 = vmatpush.bf16.msra.mxu3 %v796_v4 }
  0x8c   : > { %280 = vadd.xlane.f32.xlu2 %v271_v26  ;;  %v759_v26 = vld [vmem:[%s1209_s1 + $0x10] sm:$0xf] }
  0x8d   : > { %278 = vadd.xlane.f32.xlu1 %v270_v27  ;;  %v246_v28 = vpop.xlane.xlu2 %245  ;;  %v238_v29 = vpop.xlane.xlu0 %237  ;;  %v820_v27 = vld [vmem:[%s1209_s1 + $0x14] sm:$0xf0] }
  0x8e   : > { %v261_v30 = vmul.f32 %v964_v18, %v246_v28  ;;  %v257_v31 = vmul.f32 %v964_v18, %v238_v29  ;;  %v236_v32 = vpop.xlane.xlu1 %235  ;;  %v819_v28 = vld [vmem:[%s1209_s1 + $0x14] sm:$0xf] }
  0x8f   : > { %v256_v33 = vmul.f32 %v964_v18, %v236_v32 }
  0x90   : > { %v980_v35 = vsub.f32 %v848_v7, %v261_v30  ;;  %v982_v36 = vsub.f32 %v840_v8, %v257_v31  ;;  %v825_v7 = vld [vmem:[%s1209_s1 + $0x44] sm:$0xf]  ;;  %v784_v8 = vor.u32 %v826_v6, %v783_v5  ;;  %v760_v30 = vor.u32 %v820_v27, %v759_v26  ;;  %v761_v31 = vld [vmem:[%s1209_s1 + $0x18] sm:$0xf0] }
  0x91   : > { %v984_v37 = vsub.f32 %v839_v9, %v256_v33  ;;  %v785_v9 = vld [vmem:[%s1209_s1 + $0x48] sm:$0xf0]  ;;  %v764_v34 = vor.u32 %v819_v28, %v761_v31 }
  0x92   : > { %v273_v38 = vmul.f32 %v982_v36, %v982_v36  ;;  %v277_v39 = vmul.f32 %v980_v35, %v980_v35  ;;  %517 = vmatpush.bf16.msra.mxu0 %v784_v8  ;;  %567 = vmatpush.bf16.msra.mxu2 %v784_v8 }
  0x93   : > { %v272_v40 = vmul.f32 %v984_v37, %v984_v37 }
  0x94   : > { %284 = vadd.xlane.f32.xlu0 %v273_v38 }
  0x95   : > { %292 = vadd.xlane.f32.xlu1 %v277_v39  ;;  %282 = vadd.xlane.f32.xlu2 %v272_v40  ;;  %v240_v42 = vpop.xlane.xlu0 %239  ;;  %v751_v40 = vld [vmem:[%s1209_s1] sm:$0xf] }
  0x96   : > { %v258_v43 = vmul.f32 %v964_v18, %v240_v42  ;;  %v244_v44 = vpop.xlane.xlu1 %243  ;;  %v818_v42 = vld [vmem:[%s1209_s1 + $0x4] sm:$0xf0] }
  0x97   : > { %v260_v47 = vmul.f32 %v964_v18, %v244_v44  ;;  %v752_v44 = vor.u32 %v818_v42, %v751_v40 }
  0x98   : > { %v995_v45 = vsub.f32 %v843_v10, %v258_v43  ;;  %v788_v10 = vor.u32 %v825_v7, %v785_v9 }
  0x99   : > { %v1002_v49 = vsub.f32 %v847_v11, %v260_v47  ;;  %v775_v11 = vld [vmem:[%s1209_s1 + $0x30] sm:$0xf]  ;;  %v753_v47 = vld [vmem:[%s1209_s1 + $0x8] sm:$0xf0] }
  0x9a   : > { %v274_v48 = vmul.f32 %v995_v45, %v995_v45  ;;  %536 = vmatpush.bf16.msra.mxu1 %v788_v10  ;;  %586 = vmatpush.bf16.msra.mxu3 %v788_v10  ;;  %v776_v14 = vor.u32 %v824_v12, %v775_v11 }
  0x9b   : > { %v276_v50 = vmul.f32 %v1002_v49, %v1002_v49 }
  0x9c   : > { %288 = vadd.xlane.f32.xlu0 %v275_v46  ;;  %518 = vmatpush.bf16.msra.mxu0 %v776_v14  ;;  %v817_v46 = vld [vmem:[%s1209_s1 + $0x4] sm:$0xf] }
  0x9d   : > { %286 = vadd.xlane.f32.xlu2 %v274_v48  ;;  %568 = vmatpush.bf16.msra.mxu2 %v776_v14  ;;  %v756_v48 = vor.u32 %v817_v46, %v753_v47 }
  0x9e   : > { %537 = vmatpush.bf16.msra.mxu1 %v780_v16  ;;  %587 = vmatpush.bf16.msra.mxu3 %v780_v16 }
  0xa0   : > { %519 = vmatpush.bf16.msra.mxu0 %v768_v21 }
  0xa1   : > { %569 = vmatpush.bf16.msra.mxu2 %v768_v21 }
  0xa2   : > { %538 = vmatpush.bf16.msra.mxu1 %v772_v23  ;;  %588 = vmatpush.bf16.msra.mxu3 %v772_v23 }
  0xa4   : > { %290 = vadd.xlane.f32.xlu0 %v276_v50  ;;  %520 = vmatpush.bf16.msra.mxu0 %v760_v30 }
  0xa5   : > { %570 = vmatpush.bf16.msra.mxu2 %v760_v30 }
  0xa6   : > { %539 = vmatpush.bf16.msra.mxu1 %v764_v34  ;;  %589 = vmatpush.bf16.msra.mxu3 %v764_v34 }
  0xa8   : > { %521 = vmatpush.bf16.msra.mxu0 %v752_v44 }
  0xa9   : > { %571 = vmatpush.bf16.msra.mxu2 %v752_v44 }
  0xaa   : > { %540 = vmatpush.bf16.msra.mxu1 %v756_v48  ;;  %590 = vmatpush.bf16.msra.mxu3 %v756_v48 }
  0xff   : > { %v281_v29 = vpop.xlane.xlu2 %280 }
 0x100   : > { %v295_v32 = vmul.f32 %v281_v29, %v964_v18  ;;  %v279_v33 = vpop.xlane.xlu1 %278 }
 0x101   : > { %v294_v38 = vmul.f32 %v279_v33, %v964_v18 }
 0x102   : > { %v303_v39 = vadd.f32 1e-05, %v295_v32 }
 0x103   : > { %v302_v43 = vadd.f32 1e-05, %v294_v38 }
 0x104   : > { %879 = vrsqrt.f32 %v303_v39  ;;  %vm326_vm4 = vweird.f32 %v303_v39 }
 0x105   : > { %881 = vrsqrt.f32 %v302_v43  ;;  %vm316_vm2 = vweird.f32 %v302_v43 }
 0x107   : > { %v285_v50 = vpop.xlane.xlu0 %284 }
 0x108   : > { %v297_v51 = vmul.f32 %v285_v50, %v964_v18  ;;  %v283_v52 = vpop.xlane.xlu2 %282  ;;  %v293_v53 = vpop.xlane.xlu1 %292 }
 0x109   : > { %v296_v54 = vmul.f32 %v283_v52, %v964_v18  ;;  %v301_v55 = vmul.f32 %v293_v53, %v964_v18 }
 0x10a   : > { %v880_v56 = vpop.eup %879  ;;  %v305_v57 = vadd.f32 1e-05, %v297_v51 }
 0x10b   : > { %v882_v58 = vpop.eup %881  ;;  %v321_v59 = vmul.f32 %v880_v56, %v303_v39  ;;  %v304_v60 = vadd.f32 1e-05, %v296_v54  ;;  %v1107_v61 = vadd.f32 1e-05, %v301_v55  ;;  %vm327_vm1 = vweird.f32 %v880_v56 }
 0x10c   : > { %v311_v62 = vmul.f32 %v882_v58, %v302_v43  ;;  %883 = vrsqrt.f32 %v305_v57  ;;  %vm317_vm3 = vweird.f32 %v882_v58  ;;  %vm1120_vm5 = vmor %vm326_vm4, %vm327_vm1  ;;  %vm346_vm10 = vweird.f32 %v305_v57 }
 0x10d   : > { %v322_v63 = vmul.f32 %v880_v56, %v321_v59  ;;  %885 = vrsqrt.f32 %v304_v60  ;;  %vm1126_vm6 = vmor %vm316_vm2, %vm317_vm3  ;;  %vm336_vm8 = vweird.f32 %v304_v60  ;;  %vm386_vm13 = vweird.f32 %v1107_v61 }
 0x10e   : > { %v312_v0 = vmul.f32 %v882_v58, %v311_v62  ;;  %887 = vrsqrt.f32 %v1107_v61 }
 0x10f   : > { %v323_v1 = vmul.f32 0.5, %v322_v63  ;;  %v289_v2 = vpop.xlane.xlu0 %288 }
 0x110   : > { %v313_v3 = vmul.f32 0.5, %v312_v0  ;;  %v299_v4 = vmul.f32 %v289_v2, %v964_v18  ;;  %v287_v5 = vpop.xlane.xlu2 %286 }
 0x111   : > { %v324_v6 = vsub.f32 1.5, %v323_v1  ;;  %v298_v7 = vmul.f32 %v287_v5, %v964_v18 }
 0x112   : > { %v884_v8 = vpop.eup %883  ;;  %v314_v9 = vsub.f32 1.5, %v313_v3  ;;  %v1112_v10 = vadd.f32 1e-05, %v299_v4 }
 0x113   : > { %v886_v11 = vpop.eup %885  ;;  %v341_v12 = vmul.f32 %v884_v8, %v305_v57  ;;  %v1114_v13 = vadd.f32 1e-05, %v298_v7  ;;  %v325_v14 = vmul.f32 %v880_v56, %v324_v6  ;;  %vm347_vm7 = vweird.f32 %v884_v8 }
 0x114   : > { %v1116_v15 = vpop.eup %887  ;;  %v331_v16 = vmul.f32 %v886_v11, %v304_v60  ;;  %889 = vrsqrt.f32 %v1112_v10  ;;  %v315_v22 = vmul.f32 %v882_v58, %v314_v9  ;;  %vm337_vm9 = vweird.f32 %v886_v11  ;;  %vm348_vm11 = vmor %vm346_vm10, %vm347_vm7 }
 0x115   : > { %v342_v17 = vmul.f32 %v884_v8, %v341_v12  ;;  %891 = vrsqrt.f32 %v1114_v13  ;;  %v381_v21 = vmul.f32 %v1116_v15, %v1107_v61  ;;  %v329_v28 = vsel %vm1120_vm5, %v880_v56, %v325_v14  ;;  %vm338_vm12 = vmor %vm336_vm8, %vm337_vm9 }
 0x116   : > { %v332_v20 = vmul.f32 %v886_v11, %v331_v16  ;;  %v319_v31 = vsel %vm1126_vm6, %v882_v58, %v315_v22  ;;  %v391_v40 = vmul.f32 %v329_v28, %v968_v24  ;;  %vm387_vm14 = vweird.f32 %v1116_v15 }
 0x117   : > { %v343_v26 = vmul.f32 0.5, %v342_v17  ;;  %v291_v27 = vpop.xlane.xlu0 %290  ;;  %v382_v38 = vmul.f32 %v1116_v15, %v381_v21  ;;  %v390_v43 = vmul.f32 %v319_v31, %v970_v25  ;;  %vm356_vm15 = vweird.f32 %v1114_v13  ;;  %vm1163_vm3 = vmor %vm386_vm13, %vm387_vm14 }
 0x118   : > { %v333_v29 = vmul.f32 0.5, %v332_v20  ;;  %v300_v30 = vmul.f32 %v291_v27, %v964_v18  ;;  %v399_v51 = vpack.c.bf16 %v391_v40, %v391_v40  ;;  %vm366_vm4 = vweird.f32 %v1112_v10 }
 0x119   : > { %v344_v32 = vsub.f32 1.5, %v343_v26  ;;  %v383_v24 = vmul.f32 0.5, %v382_v38  ;;  %v398_v54 = vpack.c.bf16 %v390_v43, %v390_v43 }
 0x11a   : > { %v1135_v33 = vpop.eup %889  ;;  %v334_v34 = vsub.f32 1.5, %v333_v29  ;;  %v1138_v39 = vadd.f32 1e-05, %v300_v30  ;;  %v556_v3 = vunpack.c.l.b16 %v399_v51 }
 0x11b   : > { %v892_v42 = vpop.eup %891  ;;  %v361_v18 = vmul.f32 %v1135_v33, %v1112_v10  ;;  %v345_v48 = vmul.f32 %v884_v8, %v344_v32  ;;  %v384_v60 = vsub.f32 1.5, %v383_v24  ;;  %vm367_vm1 = vweird.f32 %v1135_v33 }
 0x11c   : > { %v351_v44 = vmul.f32 %v892_v42, %v1114_v13  ;;  %893 = vrsqrt.f32 %v1138_v39  ;;  %v335_v47 = vmul.f32 %v886_v11, %v334_v34  ;;  %vm357_vm0 = vweird.f32 %v892_v42  ;;  %vm368_vm5 = vmor %vm366_vm4, %vm367_vm1 }
 0x11d   : > { %v362_v46 = vmul.f32 %v1135_v33, %v361_v18  ;;  %v349_v55 = vsel %vm348_vm11, %v884_v8, %v345_v48  ;;  %v426_v2 = vunpack.c.l.b16 %v398_v54  ;;  %vm1154_vm2 = vmor %vm356_vm15, %vm357_vm0  ;;  %v385_v12 = vmul.f32 %v1116_v15, %v384_v60 }
 0x11e   : > { %v352_v50 = vmul.f32 %v892_v42, %v351_v44  ;;  %v339_v53 = vsel %vm338_vm12, %v886_v11, %v335_v47  ;;  %v393_v57 = vmul.f32 %v349_v55, %v982_v36  ;;  %vm376_vm6 = vweird.f32 %v1138_v39 }
 0x11f   : > { %v363_v52 = vmul.f32 0.5, %v362_v46  ;;  %v392_v56 = vmul.f32 %v339_v53, %v984_v37  ;;  %v389_v17 = vsel %vm1163_vm3, %v1116_v15, %v385_v12 }
 0x120   : > { %v353_v25 = vmul.f32 0.5, %v352_v50  ;;  %v401_v0 = vpack.c.bf16 %v393_v57, %v393_v57  ;;  %v397_v22 = vmul.f32 %v389_v17, %v980_v35  ;;  %v602_v35 = vld [vmem:[%s1210_s2] sm:$0xf] }
 0x121   : > { %v364_v58 = vsub.f32 1.5, %v363_v52  ;;  %v400_v63 = vpack.c.bf16 %v392_v56, %v392_v56  ;;  %v606_v18 = vperm.slane %v602_v35, 2  ;;  %v607_v43 = vperm.slane %v602_v35, 3 }
 0x122   : > { %v894_v59 = vpop.eup %893  ;;  %v354_v62 = vsub.f32 1.5, %v353_v25  ;;  %v557_v4 = vunpack.c.l.b16 %v401_v0  ;;  %v405_v29 = vpack.c.bf16 %v397_v22, %v397_v22 }
 0x123   : > { %v371_v1 = vmul.f32 %v894_v59, %v1138_v39  ;;  %v427_v36 = vunpack.c.l.b16 %v400_v63  ;;  %v365_v6 = vmul.f32 %v1135_v33, %v364_v58  ;;  %vm377_vm7 = vweird.f32 %v894_v59 }
 0x124   : > { %v355_v5 = vmul.f32 %v892_v42, %v354_v62  ;;  %v560_v11 = vpack.c.b16 %v557_v4, %v556_v3  ;;  %vm378_vm8 = vmor %vm376_vm6, %vm377_vm7 }
 0x125   : > { %v372_v7 = vmul.f32 %v894_v59, %v371_v1  ;;  %v430_v9 = vpack.c.b16 %v427_v36, %v426_v2  ;;  %v369_v61 = vsel %vm368_vm5, %v1135_v33, %v365_v6  ;;  %v559_v33 = vunpack.c.l.b16 %v405_v29 }
 0x126   : > { %v359_v14 = vsel %vm1154_vm2, %v892_v42, %v355_v5  ;;  %572 = vmatmul.bf16.vlgmr.msra.gmra.mxu2 %v560_v11  ;;  %591 = vmatmul.bf16.vlgmr.msra.gmra.mxu3 %v560_v11  ;;  %v395_v20 = vmul.f32 %v369_v61, %v992_v41  ;;  %v604_v41 = vperm.slane %v602_v35, 0 }
 0x127   : > { %v373_v13 = vmul.f32 0.5, %v372_v7  ;;  %522 = vmatmul.bf16.vlgmr.msra.gmra.mxu0 %v430_v9  ;;  %541 = vmatmul.bf16.vlgmr.msra.gmra.mxu1 %v430_v9  ;;  %v394_v10 = vmul.f32 %v359_v14, %v995_v45 }
 0x128   : > { %v403_v27 = vpack.c.bf16 %v395_v20, %v395_v20 }
 0x129   : > { %v374_v16 = vsub.f32 1.5, %v373_v13  ;;  %v402_v26 = vpack.c.bf16 %v394_v10, %v394_v10 }
 0x12a   : > { %v558_v31 = vunpack.c.l.b16 %v403_v27 }
 0x12b   : > { %v375_v19 = vmul.f32 %v894_v59, %v374_v16  ;;  %v428_v30 = vunpack.c.l.b16 %v402_v26 }
 0x12c   : > { %v561_v15 = vpack.c.b16 %v559_v33, %v558_v31 }
 0x12d   : > { %v379_v21 = vsel %vm378_vm8, %v894_v59, %v375_v19 }
 0x12e   : > { %v396_v23 = vmul.f32 %v379_v21, %v1002_v49  ;;  %v605_v49 = vperm.slane %v602_v35, 1 }
 0x130   : > { %v404_v28 = vpack.c.bf16 %v396_v23, %v396_v23 }
 0x132   : > { %v429_v45 = vunpack.c.l.b16 %v404_v28 }
 0x134   : > { %v431_v32 = vpack.c.b16 %v429_v45, %v428_v30 }
 0x136   : > { %577 = vmatmul.bf16.gmra.mxu2 %v561_v15  ;;  %596 = vmatmul.bf16.gmra.mxu3 %v561_v15 }
 0x137   : > { %527 = vmatmul.bf16.gmra.mxu0 %v431_v32  ;;  %546 = vmatmul.bf16.gmra.mxu1 %v431_v32 }
 0x1a4   : > { %v523_v34 = vpop.f32.mrf.mxu0  ;;  %v542_v38 = vpop.f32.mrf.mxu1 }
 0x1a5   : > { %v612_v39 = vadd.f32 %v604_v41, %v523_v34  ;;  %v613_v40 = vadd.f32 %v605_v49, %v542_v38 }
 0x1a7   : > { %v628_v42 = vpack.c.bf16 %v613_v40, %v612_v39 }
 0x1a9   : > { %636 = vst [vmem:[%s1189_s20] sm:$0xff] %v628_v42  ;;  %v573_v44 = vpop.f32.mrf.mxu2  ;;  %v592_v46 = vpop.f32.mrf.mxu3 }
 0x1aa   : > { %v614_v47 = vadd.f32 %v606_v18, %v573_v44  ;;  %v615_v48 = vadd.f32 %v607_v43, %v592_v46 }
 0x1ac   : > { %v525_v24 = vpop.f32.mrf.mxu0  ;;  %v544_v50 = vpop.f32.mrf.mxu1  ;;  %v629_v53 = vpack.c.bf16 %v615_v48, %v614_v47 }
 0x1ad   : > { %v616_v51 = vadd.f32 %v604_v41, %v525_v24  ;;  %v617_v52 = vadd.f32 %v605_v49, %v544_v50 }
 0x1ae   : > { %637 = vst [vmem:[%s1189_s20 + $0x8] sm:$0xff] %v629_v53 }
 0x1af   : > { %v630_v54 = vpack.c.bf16 %v617_v52, %v616_v51 }
 0x1b1   : > { %638 = vst [vmem:[%s1189_s20 + $0x10] sm:$0xff] %v630_v54  ;;  %v575_v55 = vpop.f32.mrf.mxu2  ;;  %v594_v25 = vpop.f32.mrf.mxu3 }
 0x1b2   : > { %v618_v56 = vadd.f32 %v606_v18, %v575_v55  ;;  %v619_v57 = vadd.f32 %v607_v43, %v594_v25 }
 0x1b4   : > { %v528_v58 = vpop.f32.mrf.mxu0  ;;  %v547_v59 = vpop.f32.mrf.mxu1  ;;  %v631_v63 = vpack.c.bf16 %v619_v57, %v618_v56 }
 0x1b5   : > { %v620_v60 = vadd.f32 %v604_v41, %v528_v58  ;;  %v621_v62 = vadd.f32 %v605_v49, %v547_v59 }
 0x1b6   : > { %639 = vst [vmem:[%s1189_s20 + $0x18] sm:$0xff] %v631_v63 }
 0x1b7   : > { %v632_v0 = vpack.c.bf16 %v621_v62, %v620_v60 }
 0x1b9   : > { %640 = vst [vmem:[%s1189_s20 + $0x20] sm:$0xff] %v632_v0  ;;  %v578_v1 = vpop.f32.mrf.mxu2  ;;  %v597_v2 = vpop.f32.mrf.mxu3 }
 0x1ba   : > { %v622_v3 = vadd.f32 %v606_v18, %v578_v1  ;;  %v623_v37 = vadd.f32 %v607_v43, %v597_v2 }
 0x1bc   : > { %v530_v36 = vpop.f32.mrf.mxu0  ;;  %v549_v4 = vpop.f32.mrf.mxu1  ;;  %v633_v7 = vpack.c.bf16 %v623_v37, %v622_v3 }
 0x1bd   : > { %v624_v5 = vadd.f32 %v604_v41, %v530_v36  ;;  %v625_v6 = vadd.f32 %v605_v49, %v549_v4 }
 0x1be   : > { %641 = vst [vmem:[%s1189_s20 + $0x28] sm:$0xff] %v633_v7 }
 0x1bf   : > { %v634_v8 = vpack.c.bf16 %v625_v6, %v624_v5 }
 0x1c1   : > { %642 = vst [vmem:[%s1189_s20 + $0x30] sm:$0xff] %v634_v8  ;;  %v580_v9 = vpop.f32.mrf.mxu2  ;;  %v599_v11 = vpop.f32.mrf.mxu3 }
 0x1c2   : > { %v626_v12 = vadd.f32 %v606_v18, %v580_v9  ;;  %v627_v13 = vadd.f32 %v607_v43, %v599_v11 }
 0x1c4   : > { %v635_v14 = vpack.c.bf16 %v627_v13, %v626_v12 }
 0x1c6   : > { %643 = vst [vmem:[%s1189_s20 + $0x38] sm:$0xff] %v635_v14 }
 0x1c7 PF: > { %s13_s14 = sadd.s32 1, %s917_s14   ;;  %s1220_s12 = smov %s913_s13 }
 0x1c8   : > { %p10_p5 = scmp.ge.s32.totalorder %s13_s14, 4   ;;  %s1221_s13 = smov %s1223_s15 }
 0x1ca   :  { %12 = sbr.rel (!%p10_p5) target bundleno = 2 (0x2), region = 62 }

</bundles_post_ra>
